<compile_context>
chip_gen: v6e
topology: v6e:2x2x1
jax: 0.10.0
libtpu: 0.0.40
codegen_flags: <defaults>
</compile_context>

<pallas_src>
import jax
import jax.numpy as jnp
from jax import lax
from jax.experimental import pallas as pl
from jax.experimental.pallas import tpu as pltpu


def _pick_tile(dim, candidates):
    """Largest candidate that divides `dim`, else the full dim (no tiling)."""
    for t in candidates:
        if dim % t == 0:
            return t
    return dim


def pooler_kernel(x_ref, w_ref, b_ref, o_ref, acc_ref):
    # x_ref:   [B_pad, tk]  first-token activations (K slice)
    # w_ref:   [tn, tk]     weight in PyTorch [out, in] layout (N, K slice)
    # b_ref:   [1, tn]      bias (N slice)
    # o_ref:   [B_pad, tn]  output tile (resident across the K loop)
    # acc_ref: [B_pad, tn]  f32 accumulator scratch
    k = pl.program_id(1)

    @pl.when(k == 0)
    def _():
        acc_ref[...] = jnp.zeros_like(acc_ref)

    # Contract x's K axis against w's last (in) axis: rhs-transposed matmul on
    # the MXU; the per-tile transpose is in-core, no HBM round trip.
    acc_ref[...] += lax.dot_general(
        x_ref[...],
        w_ref[...],
        dimension_numbers=(((1,), (1,)), ((), ())),
        preferred_element_type=jnp.float32,
    )

    @pl.when(k == pl.num_programs(1) - 1)
    def _():
        y = acc_ref[...] + b_ref[...].astype(jnp.float32)
        o_ref[...] = jnp.tanh(y).astype(o_ref.dtype)


def new_pooler(hidden_states, weight, bias, *, tn=None, tk=None):
    """hidden_states: [B, S, H]; weight: [H, H] (PyTorch Linear [out, in]);
    bias: [H]. Returns [B, H] = tanh(hidden_states[:, 0] @ W^T + b)."""
    B, S, H = hidden_states.shape

    # TODO(synk): the first-token slice is a tiny [B, H] copy done in plain
    # JAX; fusing it into the x BlockSpec (size-1 seq block) would remove it.
    x = hidden_states[:, 0, :]

    # Pad batch to a multiple of 8 sublanes (explicit MXU M alignment,
    # unmasked loads/stores on the activation/output tiles).
    b_pad = max(8, ((B + 7) // 8) * 8)
    if b_pad != B:
        x = jnp.pad(x, ((0, b_pad - B), (0, 0)))

    # Lane-dense N tile (multiple of 128 when possible), larger K tile.
    if tn is None:
        tn = _pick_tile(H, (256, 128))
    if tk is None:
        tk = _pick_tile(H, (512, 256, 128))

    bias2 = bias.reshape(1, H)

    grid = (H // tn, H // tk)  # (N tiles, K tiles); K innermost = reduction

    out = pl.pallas_call(
        pooler_kernel,
        out_shape=jax.ShapeDtypeStruct((b_pad, H), hidden_states.dtype),
        grid_spec=pltpu.PrefetchScalarGridSpec(
            num_scalar_prefetch=0,
            grid=grid,
            in_specs=[
                pl.BlockSpec((b_pad, tk), lambda j, k: (0, k)),   # x
                pl.BlockSpec((tn, tk), lambda j, k: (j, k)),      # W [out, in]
                pl.BlockSpec((1, tn), lambda j, k: (0, j)),       # bias
            ],
            out_specs=pl.BlockSpec((b_pad, tn), lambda j, k: (0, j)),
            scratch_shapes=[pltpu.VMEM((b_pad, tn), jnp.float32)],
        ),
        compiler_params=pltpu.CompilerParams(
            # N tiles shard across TensorCores (v7x megacore); K is the
            # accumulated reduction axis and stays sequential.
            dimension_semantics=("parallel", "arbitrary"),
            # Per-tile buffers are tiny (<= ~1 MiB double-buffered); explicit
            # limit keeps headroom under v7x's 64 MiB physical VMEM.
            vmem_limit_bytes=32 * 1024 * 1024,
        ),
    )(x, weight, bias2)

    return out[:B]


if __name__ == "__main__":
    def reference(hs, w, b):
        return jnp.tanh(hs[:, 0, :] @ w.T + b)

    # Case 1: small shapes consistent with the module (batch=2, seq=8, hidden=32).
    B, S, H = 2, 8, 32
    k_x, k_w, k_b = jax.random.split(jax.random.PRNGKey(0), 3)
    hidden_states = jax.random.normal(k_x, (B, S, H), dtype=jnp.float32)
    weight = jax.random.normal(k_w, (H, H), dtype=jnp.float32) * 0.02
    bias = jax.random.normal(k_b, (H,), dtype=jnp.float32) * 0.02

    out = jax.block_until_ready(new_pooler(hidden_states, weight, bias))
    ref = reference(hidden_states, weight, bias)
    assert out.shape == (B, H)
    assert jnp.allclose(out, ref, atol=1e-2, rtol=1e-2)

    # Case 2: exercises the tiled (N, K) accumulator path and batch padding.
    B2, S2, H2 = 3, 4, 384
    k_x2, k_w2, k_b2 = jax.random.split(jax.random.PRNGKey(1), 3)
    hs2 = jax.random.normal(k_x2, (B2, S2, H2), dtype=jnp.float32)
    w2 = jax.random.normal(k_w2, (H2, H2), dtype=jnp.float32) * 0.02
    b2 = jax.random.normal(k_b2, (H2,), dtype=jnp.float32) * 0.02

    out2 = jax.block_until_ready(new_pooler(hs2, w2, b2))
    ref2 = reference(hs2, w2, b2)
    assert out2.shape == (B2, H2)
    assert jnp.allclose(out2, ref2, atol=1e-2, rtol=1e-2)

    print("KERNEL_OK")
</pallas_src>

<mosaic_0001>
module attributes {stable_mosaic.version = 11 : i64} {
  func.func @pooler_kernel(%arg0: i32, %arg1: i32, %arg2: memref<8x32xf32, #tpu.memory_space<vmem>>, %arg3: memref<32x32xf32, #tpu.memory_space<vmem>>, %arg4: memref<1x32xf32, #tpu.memory_space<vmem>>, %arg5: memref<8x32xf32, #tpu.memory_space<vmem>>, %arg6: memref<8x32xf32, #tpu.memory_space<vmem>>) attributes {dimension_semantics = [#tpu.dimension_semantics<parallel>, #tpu.dimension_semantics<arbitrary>], iteration_bounds = array<i64: 1, 1>, scalar_prefetch = 0 : i64, scratch_operands = 1 : i64, tpu.core_type = #tpu.core_type<tc>, window_params = [{transform_indices = @transform_0, window_bounds = array<i64: 8, 32>}, {transform_indices = @transform_1, window_bounds = array<i64: 32, 32>}, {transform_indices = @transform_2, window_bounds = array<i64: 1, 32>}, {transform_indices = @transform_3, window_bounds = array<i64: 8, 32>}]} {
    %c0_i32 = arith.constant 0 : i32
    %0 = arith.cmpi eq, %arg1, %c0_i32 : i32
    %1 = arith.extui %0 : i1 to i32
    %c0_i32_0 = arith.constant 0 : i32
    %2 = arith.cmpi ne, %1, %c0_i32_0 : i32
    scf.if %2 {
      %cst_10 = arith.constant 0.000000e+00 : f32
      %12 = vector.broadcast %cst_10 : f32 to vector<8x32xf32>
      %c0_11 = arith.constant 0 : index
      %c0_12 = arith.constant 0 : index
      %13 = vector.load %arg6[%c0_11, %c0_12] : memref<8x32xf32, #tpu.memory_space<vmem>>, vector<8x32xf32>
      tpu.vector_store %arg6[%c0_11, %c0_12], %12 {strides = array<i32>} : memref<8x32xf32, #tpu.memory_space<vmem>>, vector<8x32xf32>,
    } else {
    }
    %c0 = arith.constant 0 : index
    %c0_1 = arith.constant 0 : index
    %3 = vector.load %arg6[%c0, %c0_1] : memref<8x32xf32, #tpu.memory_space<vmem>>, vector<8x32xf32>
    %c0_2 = arith.constant 0 : index
    %c0_3 = arith.constant 0 : index
    %4 = vector.load %arg2[%c0_2, %c0_3] : memref<8x32xf32, #tpu.memory_space<vmem>>, vector<8x32xf32>
    %c0_4 = arith.constant 0 : index
    %c0_5 = arith.constant 0 : index
    %5 = vector.load %arg3[%c0_4, %c0_5] : memref<32x32xf32, #tpu.memory_space<vmem>>, vector<32x32xf32>
    %cst = arith.constant dense<0.000000e+00> : vector<8x32xf32>
    %6 = tpu.matmul %4, %5, %cst {dimension_numbers = #tpu.dot_dimension_numbers<[1], [1], [0], [0], [0, 0, 1, 0], [], []>} : vector<8x32xf32>, vector<32x32xf32>, vector<8x32xf32> -> vector<8x32xf32>
    %7 = arith.addf %3, %6 : vector<8x32xf32>
    %c0_6 = arith.constant 0 : index
    %c0_7 = arith.constant 0 : index
    %8 = vector.load %arg6[%c0_6, %c0_7] : memref<8x32xf32, #tpu.memory_space<vmem>>, vector<8x32xf32>
    tpu.vector_store %arg6[%c0_6, %c0_7], %7 {strides = array<i32>} : memref<8x32xf32, #tpu.memory_space<vmem>>, vector<8x32xf32>,
    %c0_i32_8 = arith.constant 0 : i32
    %9 = arith.cmpi eq, %arg1, %c0_i32_8 : i32
    %10 = arith.extui %9 : i1 to i32
    %c0_i32_9 = arith.constant 0 : i32
    %11 = arith.cmpi ne, %10, %c0_i32_9 : i32
    scf.if %11 {
      %c0_10 = arith.constant 0 : index
      %c0_11 = arith.constant 0 : index
      %12 = vector.load %arg6[%c0_10, %c0_11] : memref<8x32xf32, #tpu.memory_space<vmem>>, vector<8x32xf32>
      %c0_12 = arith.constant 0 : index
      %c0_13 = arith.constant 0 : index
      %13 = vector.load %arg4[%c0_12, %c0_13] : memref<1x32xf32, #tpu.memory_space<vmem>>, vector<1x32xf32>
      %14 = vector.broadcast %13 : vector<1x32xf32> to vector<8x32xf32>
      %15 = arith.addf %12, %14 : vector<8x32xf32>
      %16 = math.tanh %15 : vector<8x32xf32>
      %c0_14 = arith.constant 0 : index
      %c0_15 = arith.constant 0 : index
      %17 = vector.load %arg5[%c0_14, %c0_15] : memref<8x32xf32, #tpu.memory_space<vmem>>, vector<8x32xf32>
      tpu.vector_store %arg5[%c0_14, %c0_15], %16 {strides = array<i32>} : memref<8x32xf32, #tpu.memory_space<vmem>>, vector<8x32xf32>,
    } else {
    }
    return
  }
  func.func @transform_0(%arg0: i32, %arg1: i32) -> (i32, i32) {
    %c0_i32 = arith.constant 0 : i32
    %c0_i32_0 = arith.constant 0 : i32
    return %c0_i32, %arg1 : i32, i32
  }
  func.func @transform_1(%arg0: i32, %arg1: i32) -> (i32, i32) {
    %c0_i32 = arith.constant 0 : i32
    return %arg0, %arg1 : i32, i32
  }
  func.func @transform_2(%arg0: i32, %arg1: i32) -> (i32, i32) {
    %c0_i32 = arith.constant 0 : i32
    %c0_i32_0 = arith.constant 0 : i32
    return %c0_i32, %arg0 : i32, i32
  }
  func.func @transform_3(%arg0: i32, %arg1: i32) -> (i32, i32) {
    %c0_i32 = arith.constant 0 : i32
    %c0_i32_0 = arith.constant 0 : i32
    return %c0_i32, %arg0 : i32, i32
  }
}

</mosaic_0001>

<bundles_post_ra>
// kernel: tpu_custom_call.1
= control target key start
LH: loop header
LB: loop body
LE: loop exit
PB: predicated region body
PF: predicated region fallthrough
CT: control target
= control target key end

     0   :  { %8 = vsyncpa [#allocation4], 0  ;;  %s315_s0 = inlined_call_operand.hbm [shape: f32[8,32], index: 0, kind: input, shape index: {}]   ;;  %s316_s1 = inlined_call_operand.hbm [shape: f32[32,32], index: 1, kind: input, shape index: {}]   ;;  %s317_s2 = inlined_call_operand.vmem [shape: f32[1,32], index: 2, kind: input, shape index: {}]   ;;  %s318_s3 = inlined_call_operand.hbm [shape: f32[8,32], index: 3, kind: output, shape index: {}]  }
   0x1   :  { %9 = vsyncpa [#allocation7], 0 }
   0x2   :  { %10 = vsyncpa [#allocation5], 0  ;;  %s268_s12 = smov [#allocation3]   ;;  %s269_s14 = smov [#allocation6]  }
   0x3   :  { %s17_s13 = sshll.u32 %s268_s12, 4  ;;  %s26_s15 = sshll.u32 %s269_s14, 4  ;;  %s18_s13 = int_to_ptr.vmem [resolvable:$true] %s17_s13  ;;  %s27_s15 = int_to_ptr.vmem [resolvable:$true] %s26_s15 }
   0x4   :  { %s210_s16 = scalar_lea.vmem %s18_s13, 128  ;;  %p215_p1 = scmp.lt.s32.totalorder %s18_s13, %s18_s13 }
   0x5   :  { %p211_p0 = scmp.ne.s32.totalorder %s18_s13, %s210_s16  ;;  %p216_p2 = scmp.lt.s32.totalorder %s210_s16, %s210_s16 }
   0x7   :  { %p217_p3 = por %p216_p2, %p215_p1 }
   0x9   :  { %p218_p4 = pnand %p217_p3, %p211_p0 }
   0xb   :  { %221 = shalt.err (!%p218_p4)
}
   0xc   :  { %20 = dma.hbm_to_vmem [thread:$0]  %s315_s0, 128, %s18_s13, [#allocation4]  }
   0xd   :  { %s230_s19 = scalar_lea.vmem %s27_s15, 512  ;;  %p235_p6 = scmp.lt.s32.totalorder %s27_s15, %s27_s15 }
   0xe   :  { %p231_p5 = scmp.ne.s32.totalorder %s27_s15, %s230_s19  ;;  %p236_p7 = scmp.lt.s32.totalorder %s230_s19, %s230_s19 }
  0x10   :  { %p237_p8 = por %p236_p7, %p235_p6 }
  0x12   :  { %p238_p9 = pnand %p237_p8, %p231_p5 }
  0x14   :  { %241 = shalt.err (!%p238_p9)
}
  0x15   :  { %s270_s20 = smov 128   ;;  %s271_s21 = smov 8  }
  0x16   :  { %32 = dma.hbm_to_vmem [thread:$0]  %s316_s1, 512, %s27_s15, [#allocation7], %s270_s20, %s270_s20, %s271_s21  }
  0x17   :  { %262 = dma.done.wait [#allocation4], 128  }
  0x18   :  { %263 = vsyncadd [#allocation4], 4294967168 }
  0x19   :  { %264 = dma.done.wait [#allocation7], 512  }
  0x1a   :  { %265 = vsyncadd [#allocation7], 4294966784  ;;  %vm45_vm0 = vcmask 261120   ;;  %v272_v0 = vmov 0.0   ;;  %vm273_vm1 = vmmov 0   ;;  %v52_v1 = vld [vmem:[#allocation6 + $0x18] sm:$0xff] }
  0x1b   :  { %182 = vmatprep.subr.mxu0 %v272_v0  ;;  %46 = vst.msk [vmem:[#allocation2] sm:$0xff] %vm45_vm0, %v272_v0  ;;  %190 = vmatprep.mubr.msk.f32.mxu0 %vm273_vm1, %v272_v0  ;;  %v51_v2 = vld [vmem:[#allocation6 + $0x10] sm:$0xff]  ;;  %v50_v3 = vld [vmem:[#allocation6 + $0x8] sm:$0xff]  ;;  %v49_v4 = vld [vmem:[#allocation6] sm:$0xff]  ;;  %s274_s24 = smov [#allocation8]  }
  0x1c   :  { %183 = vmatpush3.xpose.msk.msra.mxu0 %vm45_vm0, %v52_v1  ;;  %v48_v5 = vld [vmem:[#allocation3] sm:$0xff]  ;;  %v176_v10 = vld [vmem:[%s317_s2] ss:$0 sm:$0xff]  ;;  %s161_s25 = sshll.u32 %s274_s24, 4  ;;  %s162_s25 = int_to_ptr.vmem [resolvable:$true] %s161_s25 }
  0x1d   :  { %184 = vmatprep.subr.mxu0 %v272_v0  ;;  %s242_s26 = scalar_lea.vmem %s162_s25, 128  ;;  %p247_p11 = scmp.lt.s32.totalorder %s162_s25, %s162_s25 }
  0x1e   :  { %p243_p10 = scmp.ne.s32.totalorder %s162_s25, %s242_s26  ;;  %p248_p12 = scmp.lt.s32.totalorder %s242_s26, %s242_s26 }
  0x20   :  { %185 = vmatpush3.xpose.msk.msra.mxu0 %vm45_vm0, %v51_v2  ;;  %p249_p13 = por %p248_p12, %p247_p11 }
  0x21   :  { %186 = vmatprep.subr.mxu0 %v272_v0 }
  0x22   :  { %v47_v6 = vld [vmem:[#allocation2] sm:$0xff]  ;;  %p250_p0 = pnand %p249_p13, %p243_p10 }
  0x24   :  { %187 = vmatpush3.xpose.msk.msra.mxu0 %vm45_vm0, %v50_v3 }
  0x25   :  { %188 = vmatprep.subr.mxu0 %v272_v0 }
  0x28   :  { %189 = vmatpush3.xpose.msk.msra.mxu0 %vm45_vm0, %v49_v4 }
  0x2b   :  { %191 = vmatmul.mubr.msk.f32.vlgmr.msra.gmra.mxu0 %vm45_vm0, %v48_v5 }
  0xeb   :  { %v135_v7 = vpop.f32.mrf.mxu0 }
  0xec   :  { %v139_v8 = vadd.f32 %v135_v7, %v47_v6 }
  0xed   :  { %v192_v9 = vpop.f32.mrf.mxu0 }
  0xee   :  { %140 = vst.msk [vmem:[#allocation2] sm:$0xff] %vm45_vm0, %v139_v8 }
  0xf5   :  { %v144_v11 = vld [vmem:[#allocation2] sm:$0xff] }
  0xf6   :  { %v152_v12 = vadd.f32 %v176_v10, %v144_v11 }
  0xf8   :  { %200 = vtanh.f32 %v152_v12 }
 0x105   :  { %v201_v13 = vpop.eup %200 }
 0x106   :  { %154 = vst.msk [vmem:[#allocation8] sm:$0xff] %vm45_vm0, %v201_v13 }
 0x107   :  { %253 = shalt.err (!%p250_p0)
}
 0x108   :  { %164 = dma.vmem_to_hbm [thread:$0]  %s162_s25, 128, %s318_s3, [#allocation5]  }
 0x109   :  { %266 = dma.done.wait [#allocation5], 128  }
 0x10a   :  { %267 = vsyncadd [#allocation5], 4294967168 }
 0x10b   :  { %168 = vsyncpa [#allocation4], 1 }
 0x10c   :  { %169 = vsyncpa [#allocation7], 1 }
 0x10d   :  { %170 = vsyncpa [#allocation5], 1 }

</bundles_post_ra>
